<compile_context>
chip_gen: v7x
topology: tpu7x:2x2x1
jax: 0.10.0
libtpu: 0.0.40
codegen_flags: <defaults>
</compile_context>

<pallas_src>
import functools
import math

import jax
import jax.numpy as jnp
from jax.experimental import pallas as pl
from jax.experimental.pallas import tpu as pltpu


MAX_SEQ_SIZE = 64

# ~4 MiB per (emb/out) block.  Only emb + out are streamed (pe is a tiny (tl,E)
# block), so double-buffered footprint ~= 4 * 4 MiB + eps ~= 16.5 MiB, covered
# by the explicit 32 MiB vmem_limit below on every generation (v5e/v6e: 128 MiB
# physical, v7x: 64 MiB physical).
_TARGET_BLOCK_BYTES = 4 * 1024 * 1024
_VMEM_LIMIT_BYTES = 32 * 1024 * 1024


def build_pe(max_len: int, n_embed: int) -> jnp.ndarray:
    """Sinusoidal positional-encoding table, shape (max_len, n_embed), fp32.

    Matches the PyTorch __init__: row 0 stays all-zero, even columns get sin,
    odd columns get cos (rows 1..).  Odd n_embed truncates the cos half.
    """
    position = jnp.arange(max_len, dtype=jnp.float32)[:, None]              # (L, 1)
    div_term = jnp.exp(
        jnp.arange(0, n_embed, 2, dtype=jnp.float32)
        * (-(math.log(10000.0) / n_embed))
    )                                                                        # (ceil(E/2),)
    inter = position * div_term                                              # (L, ceil(E/2))
    pe = jnp.zeros((max_len, n_embed), dtype=jnp.float32)
    pe = pe.at[1:, 0::2].set(jnp.sin(inter)[1:])
    pe = pe.at[1:, 1::2].set(jnp.cos(inter)[1:, : n_embed // 2])
    return pe


def _pos_enc_kernel(emb_ref, pe_ref, out_ref, *, scale, n_batch, n_embed):
    """emb_ref/out_ref: (tl, n_batch*E) in emb dtype; pe_ref: (tl, E) fp32.

    Broadcast of pe across the batch happens here (VMEM/VPU side, hidden under
    the HBM roofline) instead of materializing an (L, B*E) pe slab in HBM.
    The multiply-add is done in fp32; cast to out dtype only at the store.
    """
    pe = pe_ref[...]                                        # (tl, E) float32
    for b in range(n_batch):                                # static unrolled loop
        sl = slice(b * n_embed, (b + 1) * n_embed)
        x = emb_ref[:, sl].astype(jnp.float32) * scale + pe
        out_ref[:, sl] = x.astype(out_ref.dtype)


def _sublane_multiple(dtype) -> int:
    """Sublane packing multiple: fp32 -> 8, bf16/fp16 -> 16, int8/fp8 -> 32."""
    bits = jnp.dtype(dtype).itemsize * 8
    return max(8, 256 // bits)


def _choose_seq_tile(seq_len: int, row_bytes: int, sub: int,
                     target_bytes: int = _TARGET_BLOCK_BYTES) -> int:
    """Seq tile: multiple of `sub` (or == seq_len), ~target_bytes per block,
    and split in two if one block would swallow the whole sequence (keeps the
    grid >= 2 for DMA pipelining and v7x dual-TensorCore sharding)."""
    if seq_len <= sub:
        return seq_len
    tl = (target_bytes // max(row_bytes, 1)) // sub * sub
    tl = max(sub, tl)
    if tl >= seq_len:
        half = (seq_len + 1) // 2
        tl = ((half + sub - 1) // sub) * sub
        if tl >= seq_len:
            return seq_len
    return int(tl)


def _choose_batch_tile(n_seq_tiles: int, batch: int, n_embed: int) -> int:
    """If the seq axis could not be split (short sequence), try splitting the
    batch/lane axis instead, keeping each lane block a multiple of 128 lanes."""
    if n_seq_tiles >= 2 or batch == 1:
        return batch
    for parts in (2, 4, 8):
        if batch % parts == 0 and ((batch // parts) * n_embed) % 128 == 0:
            return batch // parts
    return batch


def positional_encoding(emb: jnp.ndarray, pe_full: jnp.ndarray,
                        n_embed: int, dropout_prob=None,
                        seq_tile: int | None = None,
                        batch_tile: int | None = None) -> jnp.ndarray:
    """emb: (L, B, E); pe_full: (max_len, E) fp32; returns (L, B, E)."""
    L, B, E = emb.shape
    assert E == n_embed
    assert pe_full.shape[0] >= L and pe_full.shape[1] == E

    scale = math.sqrt(float(n_embed))
    sub = _sublane_multiple(emb.dtype)
    itemsize = jnp.dtype(emb.dtype).itemsize

    # Lane-dense 2-D layout for the big streams; pe stays a small (L, E) table.
    emb2d = emb.reshape(L, B * E)                     # contiguous collapse
    pe_l = pe_full[:L].astype(jnp.float32)            # keep fp32 for the add

    row_bytes = B * E * itemsize
    tl = seq_tile if seq_tile is not None else _choose_seq_tile(L, row_bytes, sub)
    assert tl == L or tl % sub == 0, (
        f"seq tile must be a multiple of {sub} for dtype {emb.dtype} or == L")
    n_seq = (L + tl - 1) // tl

    tb = batch_tile if batch_tile is not None else _choose_batch_tile(n_seq, B, E)
    assert B % tb == 0 and (tb == B or (tb * E) % 128 == 0), (
        "batch tile must divide B and keep lane blocks a multiple of 128")
    n_bt = B // tb

    kernel = functools.partial(_pos_enc_kernel, scale=scale,
                               n_batch=tb, n_embed=E)

    out2d = pl.pallas_call(
        kernel,
        out_shape=jax.ShapeDtypeStruct((L, B * E), emb.dtype),
        grid_spec=pltpu.PrefetchScalarGridSpec(
            num_scalar_prefetch=0,
            grid=(n_seq, n_bt),
            in_specs=[
                pl.BlockSpec((tl, tb * E), lambda i, j: (i, j)),   # emb stream
                pl.BlockSpec((tl, E), lambda i, j: (i, 0)),        # small pe table
            ],
            out_specs=pl.BlockSpec((tl, tb * E), lambda i, j: (i, j)),
        ),
        compiler_params=pltpu.CompilerParams(
            dimension_semantics=("parallel", "parallel"),
            vmem_limit_bytes=_VMEM_LIMIT_BYTES),
    )(emb2d, pe_l)

    # TODO(synk): training-mode dropout (nn.Dropout) not applied; would need
    # pltpu.prng_seed/prng_random_bits to generate a stochastic mask in-kernel.
    return out2d.reshape(L, B, E)


def reference(emb, pe_full, n_embed):
    L = emb.shape[0]
    return emb * math.sqrt(float(n_embed)) + pe_full[:L][:, None, :]


if __name__ == "__main__":
    key = jax.random.PRNGKey(0)

    # 1) Small shape matching the module's intent (seq=8, batch=2, hidden=32).
    L, B, E = 8, 2, 32
    emb = jax.random.normal(key, (L, B, E), dtype=jnp.float32)
    pe_full = build_pe(MAX_SEQ_SIZE, E)

    out = jax.block_until_ready(
        positional_encoding(emb, pe_full, n_embed=E, dropout_prob=None))
    ref = reference(emb, pe_full, E)
    assert out.shape == (L, B, E)
    assert jnp.allclose(out, ref, atol=1e-5, rtol=1e-5), "mismatch (small)"

    # 2) Tiled multi-block path (grid > 1, lane-dense E=128), fp32.
    L2, B2, E2 = 64, 4, 128
    emb2 = jax.random.normal(jax.random.PRNGKey(0), (L2, B2, E2), dtype=jnp.float32)
    pe_full2 = build_pe(MAX_SEQ_SIZE, E2)

    out2 = jax.block_until_ready(
        positional_encoding(emb2, pe_full2, n_embed=E2, dropout_prob=None,
                            seq_tile=8))                      # grid = (8, 1)
    ref2 = reference(emb2, pe_full2, E2)
    assert out2.shape == (L2, B2, E2)
    assert jnp.allclose(out2, ref2, atol=1e-5, rtol=1e-5), "mismatch (tiled)"

    # 3) bf16 path: dtype-aware sublane tiling (16-row multiple), fp32 add,
    #    cast only at the store.
    emb3 = jax.random.normal(jax.random.PRNGKey(0), (L2, B2, E2),
                             dtype=jnp.float32).astype(jnp.bfloat16)
    out3 = jax.block_until_ready(
        positional_encoding(emb3, pe_full2, n_embed=E2, dropout_prob=None))
    ref3 = (emb3.astype(jnp.float32) * math.sqrt(float(E2))
            + pe_full2[:L2][:, None, :]).astype(jnp.bfloat16)
    assert out3.shape == (L2, B2, E2)
    assert jnp.allclose(out3.astype(jnp.float32), ref3.astype(jnp.float32),
                        atol=1e-2, rtol=1e-2), "mismatch (bf16)"

    print("KERNEL_OK")
</pallas_src>

<mosaic_0001>
module attributes {stable_mosaic.version = 11 : i64} {
  func.func @_pos_enc_kernel(%arg0: i32, %arg1: i32, %arg2: memref<8x64xf32, #tpu.memory_space<vmem>>, %arg3: memref<8x32xf32, #tpu.memory_space<vmem>>, %arg4: memref<8x64xf32, #tpu.memory_space<vmem>>) attributes {dimension_semantics = [#tpu.dimension_semantics<parallel>, #tpu.dimension_semantics<parallel>], iteration_bounds = array<i64: 1, 1>, scalar_prefetch = 0 : i64, scratch_operands = 0 : i64, tpu.core_type = #tpu.core_type<tc>, window_params = [{transform_indices = @transform_0, window_bounds = array<i64: 8, 64>}, {transform_indices = @transform_1, window_bounds = array<i64: 8, 32>}, {transform_indices = @transform_2, window_bounds = array<i64: 8, 64>}]} {
    %c0 = arith.constant 0 : index
    %c0_0 = arith.constant 0 : index
    %0 = vector.load %arg3[%c0, %c0_0] : memref<8x32xf32, #tpu.memory_space<vmem>>, vector<8x32xf32>
    %c0_1 = arith.constant 0 : index
    %c0_2 = arith.constant 0 : index
    %1 = vector.load %arg2[%c0_1, %c0_2] : memref<8x64xf32, #tpu.memory_space<vmem>>, vector<8x32xf32>
    %cst = arith.constant 5.65685415 : f32
    %2 = vector.broadcast %cst : f32 to vector<8x32xf32>
    %3 = arith.mulf %1, %2 : vector<8x32xf32>
    %4 = arith.addf %3, %0 : vector<8x32xf32>
    %c0_3 = arith.constant 0 : index
    %c0_4 = arith.constant 0 : index
    %5 = vector.load %arg4[%c0_3, %c0_4] : memref<8x64xf32, #tpu.memory_space<vmem>>, vector<8x32xf32>
    tpu.vector_store %arg4[%c0_3, %c0_4], %4 {strides = array<i32>} : memref<8x64xf32, #tpu.memory_space<vmem>>, vector<8x32xf32>,
    %c0_5 = arith.constant 0 : index
    %c32 = arith.constant 32 : index
    %6 = vector.load %arg2[%c0_5, %c32] : memref<8x64xf32, #tpu.memory_space<vmem>>, vector<8x32xf32>
    %cst_6 = arith.constant 5.65685415 : f32
    %7 = vector.broadcast %cst_6 : f32 to vector<8x32xf32>
    %8 = arith.mulf %6, %7 : vector<8x32xf32>
    %9 = arith.addf %8, %0 : vector<8x32xf32>
    %c0_7 = arith.constant 0 : index
    %c32_8 = arith.constant 32 : index
    %10 = vector.load %arg4[%c0_7, %c32_8] : memref<8x64xf32, #tpu.memory_space<vmem>>, vector<8x32xf32>
    tpu.vector_store %arg4[%c0_7, %c32_8], %9 {strides = array<i32>} : memref<8x64xf32, #tpu.memory_space<vmem>>, vector<8x32xf32>,
    return
  }
  func.func @transform_0(%arg0: i32, %arg1: i32) -> (i32, i32) {
    %c0_i32 = arith.constant 0 : i32
    return %arg0, %arg1 : i32, i32
  }
  func.func @transform_1(%arg0: i32, %arg1: i32) -> (i32, i32) {
    %c0_i32 = arith.constant 0 : i32
    %c0_i32_0 = arith.constant 0 : i32
    return %arg0, %c0_i32 : i32, i32
  }
  func.func @transform_2(%arg0: i32, %arg1: i32) -> (i32, i32) {
    %c0_i32 = arith.constant 0 : i32
    return %arg0, %arg1 : i32, i32
  }
}

</mosaic_0001>

<bundles_post_ra>
// kernel: tpu_custom_call.1
= control target key start
LH: loop header
LB: loop body
LE: loop exit
PB: predicated region body
PF: predicated region fallthrough
CT: control target
= control target key end

     0   :  { %7 = vsyncpa [#allocation3], 0  ;;  %s198_s0 = inlined_call_operand.hbm [shape: f32[8,64], index: 0, kind: input, shape index: {}]   ;;  %s199_s1 = inlined_call_operand.hbm [shape: f32[8,32], index: 1, kind: input, shape index: {}]   ;;  %s200_s2 = inlined_call_operand.hbm [shape: f32[8,64], index: 2, kind: output, shape index: {}]  }
   0x1   :  { %8 = vsyncpa [#allocation6], 0 }
   0x2   :  { %9 = vsyncpa [#allocation4], 0  ;;  %s143_s9 = smov [#allocation2]   ;;  %s144_s11 = smov [#allocation5]  }
   0x3   :  { %s16_s10 = sshll.u32 %s143_s9, 4  ;;  %s26_s12 = sshll.u32 %s144_s11, 4  ;;  %s17_s10 = int_to_ptr.vmem [resolvable:$true] %s16_s10  ;;  %s27_s12 = int_to_ptr.vmem [resolvable:$true] %s26_s12 }
   0x4   :  { %s71_s15 = scalar_lea.hbm %s198_s0, 128 }
   0x5   :  { %p72_p0 = scmp.ne.s32.totalorder %s198_s0, %s71_s15  ;;  %p75_p1 = scmp.lt.u32.totalorder %s71_s15, %s198_s0 }
   0x7   :  { %p77_p2 = pnand %p75_p1, %p72_p0 }
   0x9   :  { %80 = shalt.err (!%p77_p2)
}
   0xa   :  { %s81_s20 = scalar_lea.vmem %s17_s10, 128  ;;  %p86_p4 = scmp.lt.s32.totalorder %s17_s10, %s17_s10 }
   0xb   :  { %p82_p3 = scmp.ne.s32.totalorder %s17_s10, %s81_s20  ;;  %p87_p5 = scmp.lt.s32.totalorder %s81_s20, %s81_s20 }
   0xd   :  { %p88_p6 = por %p87_p5, %p86_p4 }
   0xf   :  { %p89_p7 = pnand %p88_p6, %p82_p3 }
  0x11   :  { %92 = shalt.err (!%p89_p7)
}
  0x12   :  { %19 = dma.hbm_to_vmem [thread:$0]  %s198_s0, 128, %s17_s10, [#allocation3]  }
  0x13   :  { %s93_s25 = scalar_lea.hbm %s199_s1, 128 }
  0x14   :  { %p94_p8 = scmp.ne.s32.totalorder %s199_s1, %s93_s25  ;;  %p97_p9 = scmp.lt.u32.totalorder %s93_s25, %s199_s1 }
  0x16   :  { %p99_p10 = pnand %p97_p9, %p94_p8 }
  0x18   :  { %102 = shalt.err (!%p99_p10)
}
  0x19   :  { %s103_s30 = scalar_lea.vmem %s27_s12, 128  ;;  %p108_p12 = scmp.lt.s32.totalorder %s27_s12, %s27_s12 }
  0x1a   :  { %p104_p11 = scmp.ne.s32.totalorder %s27_s12, %s103_s30  ;;  %p109_p13 = scmp.lt.s32.totalorder %s103_s30, %s103_s30 }
  0x1c   :  { %p110_p0 = por %p109_p13, %p108_p12 }
  0x1e   :  { %p111_p1 = pnand %p110_p0, %p104_p11 }
  0x20   :  { %114 = shalt.err (!%p111_p1)
}
  0x21   :  { %29 = dma.hbm_to_vmem [thread:$0]  %s199_s1, 128, %s27_s12, [#allocation6]  }
  0x22   :  { %137 = dma.done.wait [#allocation3], 128  }
  0x23   :  { %138 = vsyncadd [#allocation3], 4294967168 }
  0x24   :  { %139 = dma.done.wait [#allocation6], 128  }
  0x25   :  { %140 = vsyncadd [#allocation6], 4294967168  ;;  %v36_v0 = vld [vmem:[#allocation5] sm:$0xff]  ;;  %v37_v1 = vld [vmem:[#allocation2] sm:$0xff]  ;;  %s145_s4 = smov 32   ;;  %vm40_vm0 = vcmask 261120  }
  0x26   :  { %v38_v2 = vmul.f32 5.656854, %v37_v1  ;;  %45 = vrot.lane.b32.xlu0 %v36_v0, %s145_s4  ;;  %s146_s5 = smov [#allocation7]   ;;  %vm49_vm1 = vcmask 523520  }
  0x27   :  { %s57_s6 = sshll.u32 %s146_s5, 4  ;;  %s58_s6 = int_to_ptr.vmem [resolvable:$true] %s57_s6 }
  0x28   :  { %v39_v3 = vadd.f32 %v38_v2, %v36_v0  ;;  %s115_s1 = scalar_lea.vmem %s58_s6, 128  ;;  %p120_p3 = scmp.lt.s32.totalorder %s58_s6, %s58_s6 }
  0x29   :  { %p116_p2 = scmp.ne.s32.totalorder %s58_s6, %s115_s1  ;;  %p121_p4 = scmp.lt.s32.totalorder %s115_s1, %s115_s1 }
  0x2a   :  { %41 = vst.msk [vmem:[#allocation7] sm:$0xff] %vm40_vm0, %v39_v3 }
  0x2b   :  { %p122_p5 = por %p121_p4, %p120_p3 }
  0x2d   :  { %p123_p6 = pnand %p122_p5, %p116_p2 }
  0x98   :  { %v46_v4 = vpop.permute.xlu0 %45 }
  0x99   :  { %v48_v5 = vadd.f32 %v46_v4, %v38_v2 }
  0x9b   :  { %50 = vst.msk [vmem:[#allocation7] sm:$0xff] %vm49_vm1, %v48_v5 }
  0x9c   :  { %126 = shalt.err (!%p123_p6)
}
  0x9d   :  { %s127_s9 = scalar_lea.hbm %s200_s2, 128 }
  0x9e   :  { %p128_p7 = scmp.ne.s32.totalorder %s200_s2, %s127_s9  ;;  %p131_p8 = scmp.lt.u32.totalorder %s127_s9, %s200_s2 }
  0xa0   :  { %p133_p9 = pnand %p131_p8, %p128_p7 }
  0xa2   :  { %136 = shalt.err (!%p133_p9)
}
  0xa3   :  { %60 = dma.vmem_to_hbm [thread:$0]  %s58_s6, 128, %s200_s2, [#allocation4]  }
  0xa4   :  { %141 = dma.done.wait [#allocation4], 128  }
  0xa5   :  { %142 = vsyncadd [#allocation4], 4294967168 }
  0xa6   :  { %64 = vsyncpa [#allocation3], 1 }
  0xa7   :  { %65 = vsyncpa [#allocation6], 1 }
  0xa8   :  { %66 = vsyncpa [#allocation4], 1 }

</bundles_post_ra>
